<compile_context>
chip_gen: v7x
topology: tpu7x:2x2x1
jax: 0.10.0
libtpu: 0.0.40
codegen_flags: <defaults>
</compile_context>

<pallas_src>
import functools

import jax
import jax.numpy as jnp
from jax.experimental import pallas as pl
from jax.experimental.pallas import tpu as pltpu

ALPHA = 0.25
GAMMA = 2.0
_MAX_BLOCK_ROWS = 4096   # keeps the (tn,1) per-row intermediates (tn*512 B each) bounded


def _round_up(x, m):
    return (x + m - 1) // m * m


def _vmem_budget():
    """Return (per-buffer logits-tile byte budget, vmem_limit_bytes), chosen per chip."""
    try:
        cap = pltpu.get_tpu_info().vmem_capacity_bytes
    except Exception:
        cap = 0
    if cap >= 100 * 1024 * 1024:          # v5e / v6e: 128 MiB per TensorCore
        return 8 * 1024 * 1024, 64 * 1024 * 1024
    if cap > 0:                            # v7x: 64 MiB per TensorCore
        return 6 * 1024 * 1024, 48 * 1024 * 1024
    return 6 * 1024 * 1024, 40 * 1024 * 1024   # unknown backend -> conservative


def _focal_loss_kernel(logits_ref, targets_ref, out_ref, *,
                       alpha, gamma, n_valid, block_rows, mask_rows, emit_sum):
    # logits_ref: (tn, C) f32/bf16 VMEM; targets_ref: (tn, 1) int32 VMEM
    logits = logits_ref[...].astype(jnp.float32)
    targets = targets_ref[...]                                       # (tn, 1)
    tn, c = logits.shape

    # numerically stable log-softmax pieces (lane reductions respect the logical C extent)
    row_max = jnp.max(logits, axis=-1, keepdims=True)                # (tn, 1)
    shifted = logits - row_max                                       # (tn, C)
    lse = jnp.log(jnp.sum(jnp.exp(shifted), axis=-1, keepdims=True))  # (tn, 1)
    # TODO(synk): for small C the exp-sum lane reduce could be offloaded to the idle MXU
    # (dot with a constant ones matrix) to relieve the 2 XLUs; kept on the XLU for safety.

    # target logit via masked lane select; iota stays (1, C) and broadcasts in the compare
    class_ids = jax.lax.broadcasted_iota(jnp.int32, (1, c), 1)
    target_logit = jnp.sum(jnp.where(class_ids == targets, shifted, 0.0),
                           axis=-1, keepdims=True)                   # (tn, 1)
    # TODO(synk): out-of-range targets (t < 0 or t >= C) are silently accepted (loss = lse);
    # PyTorch's F.cross_entropy raises instead.
    bce = lse - target_logit                                         # = -log p_t

    pt = jnp.exp(-bce)
    one_minus_pt = 1.0 - pt
    if float(gamma) == 2.0:
        mod = one_minus_pt * one_minus_pt                            # VPU mul, no EUP pow
    elif float(gamma).is_integer() and gamma >= 0:
        mod = one_minus_pt ** int(gamma)                             # integer_pow -> muls
    else:
        mod = one_minus_pt ** jnp.float32(gamma)
    f_loss = jnp.float32(alpha) * mod * bce                          # (tn, 1)

    if mask_rows:  # static: only emitted when the row grid over-covers N
        row_ids = (pl.program_id(0) * block_rows
                   + jax.lax.broadcasted_iota(jnp.int32, (tn, 1), 0))
        f_loss = jnp.where(row_ids < n_valid, f_loss, 0.0)

    if emit_sum:   # 'mean'/'sum': one partial sum per tile, tiny lane-dense writeback
        out_ref[...] = jnp.broadcast_to(jnp.sum(f_loss), out_ref.shape)
    else:          # 'none': per-row losses
        # TODO(synk): a lane-dense (1, tn) per-row output would avoid the 1-lane-wide
        # store but needs a (tn,1)->(1,tn) relayout in-kernel; kept narrow for safety.
        out_ref[...] = f_loss


def focal_loss(logits, targets, alpha=ALPHA, gamma=GAMMA, reduction="mean"):
    """logits: (N, C) float32/bfloat16, targets: (N,) int class indices.

    Returns a scalar for reduction in {'mean','sum'} and an (N,) array otherwise,
    matching the PyTorch FocalLoss module.
    """
    n, c = logits.shape
    itemsize = jnp.dtype(logits.dtype).itemsize
    sub = 16 if itemsize < 4 else 8        # bf16 packs two rows per sublane

    emit_sum = reduction in ("mean", "sum")

    # ---- pick the row tile: biggest that keeps the double-buffered pipeline in budget ----
    lane_c = _round_up(c, 128)             # physical lane width of one logits row in VMEM
    per_buf_budget, vmem_limit = _vmem_budget()
    row_bytes = lane_c * itemsize + 512 + (0 if emit_sum else 512)   # logits + targets (+out)
    tn_cap = max(sub, (per_buf_budget // row_bytes) // sub * sub)
    tn_cap = min(tn_cap, _MAX_BLOCK_ROWS)
    if n < sub:
        tn = n                              # single full-extent block (tiny inputs)
    else:
        tn = min(tn_cap, (n // sub) * sub)  # multiple of the sublane granule, <= N
    num_blocks = pl.cdiv(n, tn)
    mask_rows = (num_blocks * tn != n)      # partial last block -> mask garbage rows

    targets2d = targets.reshape(n, 1).astype(jnp.int32)

    kernel = functools.partial(
        _focal_loss_kernel,
        alpha=float(alpha), gamma=float(gamma),
        n_valid=n, block_rows=tn, mask_rows=mask_rows, emit_sum=emit_sum,
    )

    if emit_sum:
        out_shape = jax.ShapeDtypeStruct((num_blocks, 1, 128), jnp.float32)
        out_specs = pl.BlockSpec((1, 1, 128), lambda i: (i, 0, 0))
        out_bytes = num_blocks * 512
    else:
        out_shape = jax.ShapeDtypeStruct((num_blocks * tn, 1), jnp.float32)
        out_specs = pl.BlockSpec((tn, 1), lambda i: (i, 0))
        out_bytes = n * 4

    cost = pl.CostEstimate(
        flops=8 * n * c,
        transcendentals=n * c + 2 * n,
        bytes_accessed=n * c * itemsize + n * 4 + out_bytes,
    )

    out = pl.pallas_call(
        kernel,
        grid=(num_blocks,),
        out_shape=out_shape,
        in_specs=[
            pl.BlockSpec((tn, c), lambda i: (i, 0)),   # logits tile (pipelined, no host pad)
            pl.BlockSpec((tn, 1), lambda i: (i, 0)),   # targets tile
        ],
        out_specs=out_specs,
        compiler_params=pltpu.CompilerParams(
            dimension_semantics=("parallel",),
            vmem_limit_bytes=vmem_limit,
        ),
        cost_estimate=cost,
    )(logits, targets2d)

    if reduction == "mean":
        return jnp.sum(out[:, 0, 0]) / jnp.float32(n)
    elif reduction == "sum":
        return jnp.sum(out[:, 0, 0])
    else:  # 'none' (and any other string, matching the PyTorch module's else branch)
        return out[:n, 0]


def _focal_loss_ref_none(logits, targets, alpha=ALPHA, gamma=GAMMA):
    logp = jax.nn.log_softmax(logits.astype(jnp.float32), axis=-1)
    bce = -jnp.take_along_axis(logp, targets[:, None].astype(jnp.int32), axis=-1)[:, 0]
    pt = jnp.exp(-bce)
    return alpha * (1.0 - pt) ** gamma * bce


if __name__ == "__main__":
    key = jax.random.PRNGKey(0)
    k1, k2, k3, k4, k5, k6 = jax.random.split(key, 6)

    # 1) tiny shape: non-128-aligned class count (C=7) + partial last row block (N=10)
    N1, C1 = 10, 7
    logits1 = jax.random.normal(k1, (N1, C1), dtype=jnp.float32)
    targets1 = jax.random.randint(k2, (N1,), 0, C1, dtype=jnp.int32)
    ref1 = _focal_loss_ref_none(logits1, targets1)

    out_mean = jax.block_until_ready(focal_loss(logits1, targets1, reduction="mean"))
    out_sum = jax.block_until_ready(focal_loss(logits1, targets1, reduction="sum"))
    out_none = jax.block_until_ready(focal_loss(logits1, targets1, reduction="none"))
    assert jnp.allclose(out_mean, jnp.mean(ref1), rtol=1e-5, atol=1e-6), (out_mean, jnp.mean(ref1))
    assert jnp.allclose(out_sum, jnp.sum(ref1), rtol=1e-5, atol=1e-6), (out_sum, jnp.sum(ref1))
    assert jnp.allclose(out_none, ref1, rtol=1e-5, atol=1e-6)

    # 2) multi-block grid, C > 128 and not lane-aligned (N=300, C=130)
    N2, C2 = 300, 130
    logits2 = jax.random.normal(k3, (N2, C2), dtype=jnp.float32)
    targets2 = jax.random.randint(k4, (N2,), 0, C2, dtype=jnp.int32)
    ref2 = _focal_loss_ref_none(logits2, targets2)
    out2_mean = jax.block_until_ready(focal_loss(logits2, targets2, reduction="mean"))
    out2_none = jax.block_until_ready(focal_loss(logits2, targets2, reduction="none"))
    assert jnp.allclose(out2_mean, jnp.mean(ref2), rtol=1e-5, atol=1e-6), (out2_mean, jnp.mean(ref2))
    assert jnp.allclose(out2_none, ref2, rtol=1e-4, atol=1e-5)

    # 3) bf16 logits path (halves HBM bytes on the big input stream)
    N3, C3 = 32, 130
    logits3 = jax.random.normal(k5, (N3, C3), dtype=jnp.float32).astype(jnp.bfloat16)
    targets3 = jax.random.randint(k6, (N3,), 0, C3, dtype=jnp.int32)
    ref3 = _focal_loss_ref_none(logits3.astype(jnp.float32), targets3)
    out3 = jax.block_until_ready(focal_loss(logits3, targets3, reduction="mean"))
    assert jnp.allclose(out3, jnp.mean(ref3), rtol=2e-2, atol=2e-3), (out3, jnp.mean(ref3))

    print("KERNEL_OK")
</pallas_src>

<mosaic_0001>
module attributes {stable_mosaic.version = 11 : i64} {
  func.func @_focal_loss_kernel(%arg0: i32, %arg1: memref<8x7xf32, #tpu.memory_space<vmem>>, %arg2: memref<8x1xi32, #tpu.memory_space<vmem>>, %arg3: memref<1x1x128xf32, #tpu.memory_space<vmem>>) attributes {dimension_semantics = [#tpu.dimension_semantics<parallel>], iteration_bounds = array<i64: 2>, scalar_prefetch = 0 : i64, scratch_operands = 0 : i64, tpu.core_type = #tpu.core_type<tc>, window_params = [{transform_indices = @transform_0, window_bounds = array<i64: 8, 7>}, {transform_indices = @transform_1, window_bounds = array<i64: 8, 1>}, {transform_indices = @transform_2, window_bounds = array<i64: 1, 1, 128>}]} {
    %c0 = arith.constant 0 : index
    %c0_0 = arith.constant 0 : index
    %0 = vector.load %arg1[%c0, %c0_0] : memref<8x7xf32, #tpu.memory_space<vmem>>, vector<8x7xf32>
    %c0_1 = arith.constant 0 : index
    %c0_2 = arith.constant 0 : index
    %1 = vector.load %arg2[%c0_1, %c0_2] : memref<8x1xi32, #tpu.memory_space<vmem>>, vector<8x1xi32>
    %cst = arith.constant dense<0xFF800000> : vector<8xf32>
    %2 = vector.multi_reduction <maximumf>, %0, %cst [1] : vector<8x7xf32> to vector<8xf32>
    %3 = vector.shape_cast %2 : vector<8xf32> to vector<8x1xf32>
    %4 = vector.broadcast %3 : vector<8x1xf32> to vector<8x7xf32>
    %5 = arith.subf %0, %4 : vector<8x7xf32>
    %6 = math.exp %5 : vector<8x7xf32>
    %cst_3 = arith.constant dense<0.000000e+00> : vector<8xf32>
    %7 = vector.multi_reduction <add>, %6, %cst_3 [1] : vector<8x7xf32> to vector<8xf32>
    %8 = vector.shape_cast %7 : vector<8xf32> to vector<8x1xf32>
    %9 = math.log %8 : vector<8x1xf32>
    %10 = tpu.iota {dimensions = array<i32: 1>} : vector<1x7xi32>
    %11 = vector.broadcast %10 : vector<1x7xi32> to vector<8x7xi32>
    %12 = vector.broadcast %1 : vector<8x1xi32> to vector<8x7xi32>
    %13 = arith.cmpi eq, %11, %12 : vector<8x7xi32>
    %cst_4 = arith.constant 0.000000e+00 : f32
    %14 = vector.broadcast %cst_4 : f32 to vector<8x7xf32>
    %15 = arith.select %13, %5, %14 : vector<8x7xi1>, vector<8x7xf32>
    %cst_5 = arith.constant dense<0.000000e+00> : vector<8xf32>
    %16 = vector.multi_reduction <add>, %15, %cst_5 [1] : vector<8x7xf32> to vector<8xf32>
    %17 = vector.shape_cast %16 : vector<8xf32> to vector<8x1xf32>
    %18 = arith.subf %9, %17 : vector<8x1xf32>
    %cst_6 = arith.constant 0.000000e+00 : f32
    %19 = vector.broadcast %cst_6 : f32 to vector<8x1xf32>
    %20 = arith.subf %19, %18 : vector<8x1xf32>
    %21 = math.exp %20 : vector<8x1xf32>
    %cst_7 = arith.constant 1.000000e+00 : f32
    %22 = vector.broadcast %cst_7 : f32 to vector<8x1xf32>
    %23 = arith.subf %22, %21 : vector<8x1xf32>
    %24 = arith.mulf %23, %23 : vector<8x1xf32>
    %cst_8 = arith.constant 2.500000e-01 : f32
    %25 = vector.broadcast %cst_8 : f32 to vector<8x1xf32>
    %26 = arith.mulf %25, %24 : vector<8x1xf32>
    %27 = arith.mulf %26, %18 : vector<8x1xf32>
    %c8_i32 = arith.constant 8 : i32
    %28 = arith.muli %arg0, %c8_i32 : i32
    %29 = tpu.iota {dimensions = array<i32: 0>} : vector<8x1xi32>
    %30 = vector.broadcast %28 : i32 to vector<8x1xi32>
    %31 = arith.addi %30, %29 : vector<8x1xi32>
    %c10_i32 = arith.constant 10 : i32
    %32 = vector.broadcast %c10_i32 : i32 to vector<8x1xi32>
    %33 = arith.cmpi slt, %31, %32 : vector<8x1xi32>
    %cst_9 = arith.constant 0.000000e+00 : f32
    %34 = vector.broadcast %cst_9 : f32 to vector<8x1xf32>
    %35 = arith.select %33, %27, %34 : vector<8x1xi1>, vector<8x1xf32>
    %36 = vector.shape_cast %35 : vector<8x1xf32> to vector<1x8x1xf32>
    %cst_10 = arith.constant dense<0.000000e+00> : vector<1xf32>
    %37 = vector.multi_reduction <add>, %36, %cst_10 [1, 2] : vector<1x8x1xf32> to vector<1xf32>
    %38 = vector.shape_cast %37 : vector<1xf32> to vector<1x1x1xf32>
    %39 = vector.extract %38[0, 0, 0] : f32 from vector<1x1x1xf32>
    %40 = vector.broadcast %39 : f32 to vector<1x1x128xf32>
    %c0_11 = arith.constant 0 : index
    %c0_12 = arith.constant 0 : index
    %c0_13 = arith.constant 0 : index
    %41 = vector.load %arg3[%c0_11, %c0_12, %c0_13] : memref<1x1x128xf32, #tpu.memory_space<vmem>>, vector<1x1x128xf32>
    tpu.vector_store %arg3[%c0_11, %c0_12, %c0_13], %40 {strides = array<i32>} : memref<1x1x128xf32, #tpu.memory_space<vmem>>, vector<1x1x128xf32>,
    return
  }
  func.func @transform_0(%arg0: i32) -> (i32, i32) {
    %c0_i32 = arith.constant 0 : i32
    %c0_i32_0 = arith.constant 0 : i32
    return %arg0, %c0_i32 : i32, i32
  }
  func.func @transform_1(%arg0: i32) -> (i32, i32) {
    %c0_i32 = arith.constant 0 : i32
    %c0_i32_0 = arith.constant 0 : i32
    return %arg0, %c0_i32 : i32, i32
  }
  func.func @transform_2(%arg0: i32) -> (i32, i32, i32) {
    %c0_i32 = arith.constant 0 : i32
    %c0_i32_0 = arith.constant 0 : i32
    %c0_i32_1 = arith.constant 0 : i32
    return %arg0, %c0_i32, %c0_i32_0 : i32, i32, i32
  }
}

</mosaic_0001>

<bundles_post_ra>
// kernel: tpu_custom_call.1
= control target key start
LH: loop header
LB: loop body
LE: loop exit
PB: predicated region body
PF: predicated region fallthrough
CT: control target
= control target key end

     0   :  { %7 = vsyncpa [#allocation3], 0  ;;  %s534_s0 = inlined_call_operand.vmem [shape: f32[10,7], index: 0, kind: input, shape index: {}]   ;;  %s535_s1 = inlined_call_operand.vmem [shape: s32[10,1], index: 1, kind: input, shape index: {}]   ;;  %s536_s2 = inlined_call_operand.hbm [shape: f32[2,1,128], index: 2, kind: output, shape index: {}]  }
   0x1   :  { %9 = vsyncpa [#allocation3 + $0x1], 0  ;;  %s427_s9 = smov 0   ;;  %s429_s10 = smov 0  }
   0x2   :  { %s431_s11 = smov 0   ;;  %s433_s12 = smov 0  }
   0x3 LB: > { %s448_s13 = sadd.s32 4294967295, %s408_s12   ;;  %s287_s14 = sadd.s32 4294967294, %s408_s12   ;;  %s408_s12 = sphi %s433_s12, %s542_s12   ;;  %s404_s11 = sphi %s431_s11, %s541_s11   ;;  %s400_s10 = sphi %s429_s10, %s540_s10   ;;  %s396_s9 = sphi %s427_s9, %s539_s9  }
   0x4   : > { %s452_s15 = sadd.s32 1, %s408_s12   ;;  %s74_s16 = sadd.s32 1, %s404_s11 }
   0x5   : > { %s71_s17 = ssub.s32 %s408_s12, %s452_s15  ;;  %p84_p0 = scmp.ne.s32.totalorder %s404_s11, %s400_s10 }
   0x6   : > { %p72_p1 = scmp.eq.s32.totalorder %s71_s17, 0  ;;  %p85_p2 = scmp.eq.s32.totalorder %s448_s13, 1 }
   0x7   : > { %p90_p3 = scmp.ne.s32.totalorder %s400_s10, %s396_s9  ;;  %p91_p4 = scmp.eq.s32.totalorder %s287_s14, 1 }
   0x8   : > { %s463_s18 = scalar_select %p72_p1, %s404_s11, %s74_s16  }
   0x9   : > { %p465_p5 = por %p85_p2, %p84_p0  ;;  %p469_p6 = por %p91_p4, %p90_p3 }
   0xa   : > { %p290_p7 = scmp.ge.s32.totalorder %s408_s12, 1  ;;  %p123_p8 = scmp.lt.s32.totalorder %s408_s12, 3 }
   0xc   : > { %p124_p9 = pnand %p290_p7, %p123_p8 }
   0xd   : > { %p147_p10 = scmp.lt.s32.totalorder (!%p124_p9), %s448_s13, 1  ;;  %v410_v0 = vmov (!%p124_p9), 0   ;;  %vm157_vm0 = vcmask (!%p124_p9), 56320   ;;  %v169_v7 = vlaneseq (!%p124_p9)  ;;  %s293_s29 = sshll.u32 (!%p124_p9), %s448_s13, 3  ;;  %vm194_vm3 = vcmask (!%p124_p9), 7168  }
   0xe   : > { %127 = sbr.rel (%p124_p9) target bundleno = 586 (0x24a), region = 28  ;;  %339 = vset.pattern.permute.xlu0 (!%p124_p9), %v410_v0  ;;  %v190_v22 = vstv (!%p124_p9), %s293_s29  ;;  %s145_s30 = sand.u32 (!%p124_p9), 1, %s400_s10  }
   0xf   : > { %v170_v8 = vand.u32 (!%p124_p9), 127, %v169_v7  ;;  %v189_v21 = vshrl.u32 (!%p124_p9), %v169_v7, 7  ;;  %s146_s3 = scalar_lea.vmem (!%p124_p9), [#allocation2], %s145_s30  ;;  %s294_s5 = sshll.u32 (!%p124_p9), %s448_s13, 4 }
  0x10   : > { %s220_s4 = sshll.u32 (!%p124_p9), %s146_s3, 4  ;;  %s494_s14 = scalar_lea.hbm (!%p124_p9), %s536_s2, %s294_s5  ;;  %s489_s4 = int_to_ptr.vmem [resolvable:$true] %s220_s4 }
  0x11   : > { %v191_v25 = vadd.s32 (!%p124_p9), %v190_v22, %v189_v21  ;;  %s208_s16 = scalar_lea.sflag (!%p124_p9), [#allocation3], %s145_s30  ;;  %s346_s17 = scalar_lea.vmem (!%p124_p9), %s489_s4, 16 }
  0x12   : > { %p347_p11 = scmp.ne.s32.totalorder (!%p124_p9), %s489_s4, %s346_s17 }
  0x13   : > { %vm192_vm2 = vcmp.lt.s32.totalorder (!%p124_p9), %v191_v25, 10 }
  0x14   : > { %p348_p12 = pnand (!%p124_p9), %p347_p11, %p465_p5 }
  0x15   : > { %s148_s21 = scalar_select %p147_p10, %s448_s13, 1 }
  0x16   : > { %p349_p13 = pneg %p348_p12  ;;  %s411_s13 = smov [#allocation2]  }
  0x17   : > { %s291_s22 = sshll.u32 %s148_s21, 3  ;;  %s350_s21 = sshll.u32 %s411_s13, 4  ;;  %s351_s21 = int_to_ptr.vmem [resolvable:$false] %s350_s21 }
  0x18   : > { %s150_s25 = scalar_lea.vmem %s534_s0, %s291_s22  ;;  %s154_s28 = scalar_lea.vmem %s535_s1, %s291_s22 }
  0x19   : > { %v155_v1 = vld [vmem:[%s150_s25] sm:$0xff]  ;;  %s352_s22 = scalar_lea.vmem %s351_s21, 32  ;;  %p353_p0 = scmp.lt.s32.totalorder %s489_s4, %s351_s21 }
  0x1a   : > { %v158_v2 = vsel %vm157_vm0, %v155_v1, -inf  ;;  %v156_v3 = vld [vmem:[%s154_s28] sm:$0xff]  ;;  %p354_p1 = scmp.lt.s32.totalorder %s352_s22, %s346_s17 }
  0x1b   : > { %159 = vmax.xlane.f32.xlu0 %v158_v2 }
  0x1c   : > { %p355_p2 = por %p354_p1, %p353_p0 }
  0x1e   : > { %p356_p3 = pnand %p355_p2, %p349_p13 }
  0x31   : > { %172 = vperm.xlu0 %339, %v156_v3  }
  0xa8   : > { %v160_v4 = vpop.xlane.xlu0 %159 }
  0xa9   : > { %v161_v5 = vsub.f32 %v155_v1, %v160_v4 }
  0xab   : > { %v162_v6 = vmul.f32 1.442695, %v161_v5 }
  0xad   : > { %340 = vpow2.f32 %v162_v6 }
  0xb0   : > { %v173_v9 = vpop.permute.xlu0 %172 }
  0xb1   : > { %vm174_vm1 = vcmp.eq.s32.totalorder %v170_v8, %v173_v9 }
  0xb2   : > { %v175_v12 = vsel %vm174_vm1, %v161_v5, 0.0 }
  0xb3   : > { %v176_v13 = vsel %vm157_vm0, %v175_v12, 0.0 }
  0xb7   : > { %v341_v10 = vpop.eup %340 }
  0xb8   : > { %v164_v11 = vsel %vm157_vm0, %v341_v10, 0.0 }
  0xb9   : > { %165 = vadd.xlane.f32.xlu1 %v164_v11 }
  0xbd   : > { %177 = vadd.xlane.f32.xlu1 %v176_v13 }
 0x146   : > { %v166_v14 = vpop.xlane.xlu1 %165 }
 0x147   : > { %342 = vlog2.f32 %v166_v14 }
 0x14a   : > { %v178_v17 = vpop.xlane.xlu1 %177 }
 0x151   : > { %v343_v15 = vpop.eup %342 }
 0x152   : > { %v168_v16 = vmul.f32 0.6931472, %v343_v15 }
 0x154   : > { %v179_v18 = vsub.f32 %v168_v16, %v178_v17 }
 0x156   : > { %v180_v19 = vsub.f32 0.0, %v179_v18 }
 0x158   : > { %v181_v20 = vmul.f32 1.442695, %v180_v19 }
 0x15a   : > { %344 = vpow2.f32 %v181_v20 }
 0x164   : > { %v345_v23 = vpop.eup %344 }
 0x165   : > { %v183_v24 = vsub.f32 1.0, %v345_v23 }
 0x167   : > { %v184_v26 = vmul.f32 %v183_v24, %v183_v24 }
 0x169   : > { %v185_v27 = vmul.f32 0.25, %v184_v26 }
 0x16b   : > { %v186_v28 = vmul.f32 %v185_v27, %v179_v18 }
 0x16d   : > { %v193_v29 = vsel %vm192_vm2, %v186_v28, 0.0 }
 0x16e   : > { %v195_v30 = vsel %vm194_vm3, %v193_v29, 0.0 }
 0x16f   : > { %196 = vadd.xlane.f32.xlu1 %v195_v30 }
 0x1fc   : > { %v197_v31 = vpop.xlane.xlu1 %196 }
 0x1fd   : > { %v198_v32 = vrot.slane %v197_v31, 4 }
 0x1ff   : > { %v199_v33 = vadd.f32 %v198_v32, %v197_v31 }
 0x201   : > { %v200_v34 = vrot.slane %v199_v33, 2 }
 0x203   : > { %v201_v35 = vadd.f32 %v200_v34, %v199_v33 }
 0x205   : > { %v202_v36 = vrot.slane %v201_v35, 1 }
 0x207   : > { %v203_v37 = vadd.f32 %v202_v36, %v201_v35 }
 0x209   : > { %297 = vpush %v203_v37 }
 0x23a   : > { %s298_s6 = spop %297 }
 0x23b   : > { %v205_v38 = vstv %s298_s6 }
 0x23c   : > { %206 = vst [vmem:[%s146_s3] sm:$0x1] %v205_v38 }
 0x23d   : > { %359 = shalt.err (!%p356_p3)
}
 0x23e   : > { %s360_s23 = scalar_lea.hbm %s494_s14, 16  ;;  %s364_s26 = scalar_lea.hbm %s536_s2, 32 }
 0x23f   : > { %p361_p4 = scmp.ne.s32.totalorder %s494_s14, %s360_s23  ;;  %p365_p9 = scmp.lt.u32.totalorder %s494_s14, %s536_s2 }
 0x240   : > { %p366_p10 = scmp.lt.u32.totalorder %s364_s26, %s360_s23  ;;  %p368_p12 = scmp.lt.u32.totalorder %s360_s23, %s494_s14 }
 0x241   : > { %p362_p7 = pnand %p361_p4, %p465_p5 }
 0x242   : > { %p367_p11 = por %p366_p10, %p365_p9 }
 0x243   : > { %p363_p8 = pneg %p362_p7 }
 0x244   : > { %p369_p13 = por %p368_p12, %p367_p11 }
 0x246   : > { %p370_p0 = pnand %p369_p13, %p363_p8 }
 0x248   : > { %373 = shalt.err (!%p370_p0)
}
 0x249   : > { %299 = dma.vmem_to_hbm [thread:$0]  (%p465_p5), %s489_s4, 16, %s494_s14, %s208_s16  }
 0x24a PF: > { %p305_p1 = scmp.ge.s32.totalorder %s408_s12, 2  ;;  %s232_s29 = sand.u32 1, %s396_s9  }
 0x24b   : > { %s233_s30 = scalar_lea.sflag [#allocation3], %s232_s29 }
 0x24c   : > { %p302_p2 = pnand %p305_p1, %p469_p6 }
 0x24e   : > { %391 = dma.done.wait (!%p302_p2), %s233_s30, 16  }
 0x24f   : > { %393 = vsyncadd (!%p302_p2), %s233_s30, 4294967280  ;;  %p12_p3 = scmp.ge.s32.totalorder %s452_s15, 4   ;;  %s539_s9 = smov %s400_s10 }
 0x250   : > { %s540_s10 = smov %s404_s11  ;;  %s541_s11 = smov %s463_s18 }
 0x251   : > { %s542_s12 = smov %s452_s15  ;;  %14 = sbr.rel (!%p12_p3) target bundleno = 3 (0x3), region = 66 }
 0x258   :  { %237 = vsyncpa [#allocation3], 1 }
 0x259   :  { %239 = vsyncpa [#allocation3 + $0x1], 1 }

</bundles_post_ra>
